<compile_context>
chip_gen: v7x
topology: tpu7x:2x2x1
jax: 0.10.0
libtpu: 0.0.40
codegen_flags: <defaults>
</compile_context>

<pallas_src>
import functools

import jax
import jax.numpy as jnp
from jax.experimental import pallas as pl
from jax.experimental.pallas import tpu as pltpu


def _round_up(x, m):
    return ((x + m - 1) // m) * m


def _decoder_kernel(latent_dim, z_ref, w1_ref, b1_ref, w2_ref, b2_ref,
                    w3_ref, b3_ref, o_ref):
    z = z_ref[...].astype(jnp.float32)        # [TB, latent_dim] (narrow lanes)
    w1 = w1_ref[...].astype(jnp.float32)      # [latent_dim, H1]

    # Layer 1 on the VPU: contraction dim is tiny (latent_dim), so use
    # rank-1 broadcast FMAs -> no MXU, no lane padding of z needed.
    h1 = b1_ref[...].astype(jnp.float32)      # [1, H1], broadcasts over batch
    for k in range(latent_dim):               # static, tiny trip count
        h1 = h1 + z[:, k:k + 1] * w1[k:k + 1, :]
    h1 = jnp.maximum(h1, 0.0)                 # [TB, H1]

    # Layer 2: Linear + ReLU on the MXU (f32 accumulation).
    h2 = jnp.dot(h1, w2_ref[...], preferred_element_type=jnp.float32)
    h2 = jnp.maximum(h2 + b2_ref[...], 0.0)   # [TB, H2]

    # Output layer: Linear, narrow (out_dim-lane) masked store is cheap.
    y = jnp.dot(h2, w3_ref[...], preferred_element_type=jnp.float32)
    o_ref[...] = (y + b3_ref[...]).astype(o_ref.dtype)


def decoder_forward(z, params, *, tb_max=2048):
    """Run the full decoder MLP in a single batch-tiled Pallas kernel.

    z: [B, latent_dim] float32
    params: dict with w1,b1,w2,b2,w3,b3 (weights already [in, out])
    """
    w1, b1 = params["w1"], params["b1"]
    w2, b2 = params["w2"], params["b2"]
    w3, b3 = params["w3"], params["b3"]

    B, latent_dim = z.shape
    h1_dim = w1.shape[1]
    h2_dim = w2.shape[1]
    out_dim = w3.shape[1]

    # Batch tile: multiple of 8 sublanes (f32).  For B > 8 force >= 2 grid
    # steps so the "parallel" axis can be split across v7x's two TensorCores.
    n_tiles = max(1, -(-B // tb_max))
    if B > 8:
        n_tiles = max(n_tiles, 2)
    TB = max(8, _round_up(-(-B // n_tiles), 8))
    Bp = _round_up(B, TB)
    z_p = z if Bp == B else jnp.pad(z, ((0, Bp - B), (0, 0)))

    grid = (Bp // TB,)

    # Advisory cost estimate with real (unpadded) dims.
    flops = 2 * Bp * (latent_dim * h1_dim + h1_dim * h2_dim + h2_dim * out_dim)
    bytes_accessed = 4 * (
        Bp * latent_dim + Bp * out_dim
        + latent_dim * h1_dim + h1_dim
        + h1_dim * h2_dim + h2_dim
        + h2_dim * out_dim + out_dim
    )

    kernel = functools.partial(_decoder_kernel, latent_dim)

    out_padded = pl.pallas_call(
        kernel,
        out_shape=jax.ShapeDtypeStruct((Bp, out_dim), jnp.float32),
        grid_spec=pltpu.PrefetchScalarGridSpec(
            num_scalar_prefetch=0,
            grid=grid,
            in_specs=[
                # batch-streamed input tile (unpadded feature dim = full dim)
                pl.BlockSpec((TB, latent_dim), lambda i: (i, 0)),
                # weights / biases: constant index_map -> VMEM-resident
                pl.BlockSpec((latent_dim, h1_dim), lambda i: (0, 0)),
                pl.BlockSpec((1, h1_dim), lambda i: (0, 0)),
                pl.BlockSpec((h1_dim, h2_dim), lambda i: (0, 0)),
                pl.BlockSpec((1, h2_dim), lambda i: (0, 0)),
                pl.BlockSpec((h2_dim, out_dim), lambda i: (0, 0)),
                pl.BlockSpec((1, out_dim), lambda i: (0, 0)),
            ],
            out_specs=pl.BlockSpec((TB, out_dim), lambda i: (i, 0)),
        ),
        compiler_params=pltpu.CompilerParams(
            dimension_semantics=("parallel",),  # split batch across TCs on v7x
        ),
        cost_estimate=pl.CostEstimate(
            flops=flops, transcendentals=0, bytes_accessed=bytes_accessed
        ),
    )(z_p, w1, b1, w2, b2, w3, b3)

    # Slice away batch padding only (no lane padding anymore).
    return out_padded[:B] if Bp != B else out_padded


def init_params(key, latent_dim=2, hidden_dims=(32, 64), output_dim=2):
    """Deterministic synthetic parameters matching nn.Linear shapes.

    PyTorch Linear stores weight as [out, in]; we store the transpose
    [in, out] so the kernel computes x @ W directly (same math as x @ W^T
    with the PyTorch-layout weight).
    """
    dims = [latent_dim] + list(hidden_dims) + [output_dim]
    params = {}
    keys = jax.random.split(key, 2 * (len(dims) - 1))
    for i in range(len(dims) - 1):
        fan_in, fan_out = dims[i], dims[i + 1]
        bound = 1.0 / jnp.sqrt(fan_in)
        w = jax.random.uniform(
            keys[2 * i], (fan_in, fan_out), jnp.float32, -bound, bound
        )
        b = jax.random.uniform(
            keys[2 * i + 1], (1, fan_out), jnp.float32, -bound, bound
        )
        params[f"w{i+1}"] = w
        params[f"b{i+1}"] = b
    return params


def decoder_reference(z, params):
    h = z
    h = jnp.maximum(h @ params["w1"] + params["b1"], 0.0)
    h = jnp.maximum(h @ params["w2"] + params["b2"], 0.0)
    return h @ params["w3"] + params["b3"]


if __name__ == "__main__":
    key = jax.random.PRNGKey(0)
    k_param, k_z1, k_z2 = jax.random.split(key, 3)

    latent_dim, hidden_dims, output_dim = 2, (32, 64), 2
    params = init_params(k_param, latent_dim, hidden_dims, output_dim)

    # Small-shape run consistent with the module defaults (single grid step).
    batch = 8
    z = jax.random.normal(k_z1, (batch, latent_dim), jnp.float32)
    out = jax.block_until_ready(decoder_forward(z, params))
    ref = decoder_reference(z, params)
    assert out.shape == (batch, output_dim), out.shape
    assert jnp.allclose(out, ref, atol=1e-5, rtol=1e-5), (
        f"max abs err = {jnp.max(jnp.abs(out - ref))}"
    )

    # Secondary check: exercises multi-step grid + batch-padding path.
    batch2 = 1030
    z2 = jax.random.normal(k_z2, (batch2, latent_dim), jnp.float32)
    out2 = jax.block_until_ready(decoder_forward(z2, params))
    ref2 = decoder_reference(z2, params)
    assert out2.shape == (batch2, output_dim), out2.shape
    assert jnp.allclose(out2, ref2, atol=1e-5, rtol=1e-5), (
        f"max abs err = {jnp.max(jnp.abs(out2 - ref2))}"
    )

    print("KERNEL_OK")
</pallas_src>

<mosaic_0001>
module attributes {stable_mosaic.version = 11 : i64} {
  func.func @_decoder_kernel(%arg0: i32, %arg1: memref<8x2xf32, #tpu.memory_space<vmem>>, %arg2: memref<2x32xf32, #tpu.memory_space<vmem>>, %arg3: memref<1x32xf32, #tpu.memory_space<vmem>>, %arg4: memref<32x64xf32, #tpu.memory_space<vmem>>, %arg5: memref<1x64xf32, #tpu.memory_space<vmem>>, %arg6: memref<64x2xf32, #tpu.memory_space<vmem>>, %arg7: memref<1x2xf32, #tpu.memory_space<vmem>>, %arg8: memref<8x2xf32, #tpu.memory_space<vmem>>) attributes {dimension_semantics = [#tpu.dimension_semantics<parallel>], iteration_bounds = array<i64: 1>, scalar_prefetch = 0 : i64, scratch_operands = 0 : i64, tpu.core_type = #tpu.core_type<tc>, window_params = [{transform_indices = @transform_0, window_bounds = array<i64: 8, 2>}, {pipeline_mode = #tpu.pipeline_mode<synchronous>, transform_indices = @transform_1, window_bounds = array<i64: 2, 32>}, {pipeline_mode = #tpu.pipeline_mode<synchronous>, transform_indices = @transform_2, window_bounds = array<i64: 1, 32>}, {pipeline_mode = #tpu.pipeline_mode<synchronous>, transform_indices = @transform_3, window_bounds = array<i64: 32, 64>}, {pipeline_mode = #tpu.pipeline_mode<synchronous>, transform_indices = @transform_4, window_bounds = array<i64: 1, 64>}, {pipeline_mode = #tpu.pipeline_mode<synchronous>, transform_indices = @transform_5, window_bounds = array<i64: 64, 2>}, {pipeline_mode = #tpu.pipeline_mode<synchronous>, transform_indices = @transform_6, window_bounds = array<i64: 1, 2>}, {transform_indices = @transform_7, window_bounds = array<i64: 8, 2>}]} {
    %c0 = arith.constant 0 : index
    %c0_0 = arith.constant 0 : index
    %0 = vector.load %arg1[%c0, %c0_0] : memref<8x2xf32, #tpu.memory_space<vmem>>, vector<8x2xf32>
    %c0_1 = arith.constant 0 : index
    %c0_2 = arith.constant 0 : index
    %1 = vector.load %arg2[%c0_1, %c0_2] : memref<2x32xf32, #tpu.memory_space<vmem>>, vector<2x32xf32>
    %c0_3 = arith.constant 0 : index
    %c0_4 = arith.constant 0 : index
    %2 = vector.load %arg3[%c0_3, %c0_4] : memref<1x32xf32, #tpu.memory_space<vmem>>, vector<1x32xf32>
    %3 = vector.extract_strided_slice %0 {offsets = [0, 0], sizes = [8, 1], strides = [1, 1]} : vector<8x2xf32> to vector<8x1xf32>
    %4 = vector.extract_strided_slice %1 {offsets = [0, 0], sizes = [1, 32], strides = [1, 1]} : vector<2x32xf32> to vector<1x32xf32>
    %5 = vector.broadcast %3 : vector<8x1xf32> to vector<8x32xf32>
    %6 = vector.broadcast %4 : vector<1x32xf32> to vector<8x32xf32>
    %7 = arith.mulf %5, %6 : vector<8x32xf32>
    %8 = vector.broadcast %2 : vector<1x32xf32> to vector<8x32xf32>
    %9 = arith.addf %8, %7 : vector<8x32xf32>
    %10 = vector.extract_strided_slice %0 {offsets = [0, 1], sizes = [8, 1], strides = [1, 1]} : vector<8x2xf32> to vector<8x1xf32>
    %11 = vector.extract_strided_slice %1 {offsets = [1, 0], sizes = [1, 32], strides = [1, 1]} : vector<2x32xf32> to vector<1x32xf32>
    %12 = vector.broadcast %10 : vector<8x1xf32> to vector<8x32xf32>
    %13 = vector.broadcast %11 : vector<1x32xf32> to vector<8x32xf32>
    %14 = arith.mulf %12, %13 : vector<8x32xf32>
    %15 = arith.addf %9, %14 : vector<8x32xf32>
    %cst = arith.constant 0.000000e+00 : f32
    %16 = vector.broadcast %cst : f32 to vector<8x32xf32>
    %17 = arith.maximumf %15, %16 : vector<8x32xf32>
    %c0_5 = arith.constant 0 : index
    %c0_6 = arith.constant 0 : index
    %18 = vector.load %arg4[%c0_5, %c0_6] : memref<32x64xf32, #tpu.memory_space<vmem>>, vector<32x64xf32>
    %cst_7 = arith.constant dense<0.000000e+00> : vector<8x64xf32>
    %19 = tpu.matmul %17, %18, %cst_7 {dimension_numbers = #tpu.dot_dimension_numbers<[1], [0], [0], [1], [0, 0, 1, 1], [], []>} : vector<8x32xf32>, vector<32x64xf32>, vector<8x64xf32> -> vector<8x64xf32>
    %c0_8 = arith.constant 0 : index
    %c0_9 = arith.constant 0 : index
    %20 = vector.load %arg5[%c0_8, %c0_9] : memref<1x64xf32, #tpu.memory_space<vmem>>, vector<1x64xf32>
    %21 = vector.broadcast %20 : vector<1x64xf32> to vector<8x64xf32>
    %22 = arith.addf %19, %21 : vector<8x64xf32>
    %cst_10 = arith.constant 0.000000e+00 : f32
    %23 = vector.broadcast %cst_10 : f32 to vector<8x64xf32>
    %24 = arith.maximumf %22, %23 : vector<8x64xf32>
    %c0_11 = arith.constant 0 : index
    %c0_12 = arith.constant 0 : index
    %25 = vector.load %arg6[%c0_11, %c0_12] : memref<64x2xf32, #tpu.memory_space<vmem>>, vector<64x2xf32>
    %cst_13 = arith.constant dense<0.000000e+00> : vector<8x2xf32>
    %26 = tpu.matmul %24, %25, %cst_13 {dimension_numbers = #tpu.dot_dimension_numbers<[1], [0], [0], [1], [0, 0, 1, 1], [], []>} : vector<8x64xf32>, vector<64x2xf32>, vector<8x2xf32> -> vector<8x2xf32>
    %c0_14 = arith.constant 0 : index
    %c0_15 = arith.constant 0 : index
    %27 = vector.load %arg7[%c0_14, %c0_15] : memref<1x2xf32, #tpu.memory_space<vmem>>, vector<1x2xf32>
    %28 = vector.broadcast %27 : vector<1x2xf32> to vector<8x2xf32>
    %29 = arith.addf %26, %28 : vector<8x2xf32>
    %c0_16 = arith.constant 0 : index
    %c0_17 = arith.constant 0 : index
    %30 = vector.load %arg8[%c0_16, %c0_17] : memref<8x2xf32, #tpu.memory_space<vmem>>, vector<8x2xf32>
    tpu.vector_store %arg8[%c0_16, %c0_17], %29 {strides = array<i32>} : memref<8x2xf32, #tpu.memory_space<vmem>>, vector<8x2xf32>,
    return
  }
  func.func @transform_0(%arg0: i32) -> (i32, i32) {
    %c0_i32 = arith.constant 0 : i32
    %c0_i32_0 = arith.constant 0 : i32
    return %arg0, %c0_i32 : i32, i32
  }
  func.func @transform_1(%arg0: i32) -> (i32, i32) {
    %c0_i32 = arith.constant 0 : i32
    %c0_i32_0 = arith.constant 0 : i32
    %c0_i32_1 = arith.constant 0 : i32
    return %c0_i32, %c0_i32_0 : i32, i32
  }
  func.func @transform_2(%arg0: i32) -> (i32, i32) {
    %c0_i32 = arith.constant 0 : i32
    %c0_i32_0 = arith.constant 0 : i32
    %c0_i32_1 = arith.constant 0 : i32
    return %c0_i32, %c0_i32_0 : i32, i32
  }
  func.func @transform_3(%arg0: i32) -> (i32, i32) {
    %c0_i32 = arith.constant 0 : i32
    %c0_i32_0 = arith.constant 0 : i32
    %c0_i32_1 = arith.constant 0 : i32
    return %c0_i32, %c0_i32_0 : i32, i32
  }
  func.func @transform_4(%arg0: i32) -> (i32, i32) {
    %c0_i32 = arith.constant 0 : i32
    %c0_i32_0 = arith.constant 0 : i32
    %c0_i32_1 = arith.constant 0 : i32
    return %c0_i32, %c0_i32_0 : i32, i32
  }
  func.func @transform_5(%arg0: i32) -> (i32, i32) {
    %c0_i32 = arith.constant 0 : i32
    %c0_i32_0 = arith.constant 0 : i32
    %c0_i32_1 = arith.constant 0 : i32
    return %c0_i32, %c0_i32_0 : i32, i32
  }
  func.func @transform_6(%arg0: i32) -> (i32, i32) {
    %c0_i32 = arith.constant 0 : i32
    %c0_i32_0 = arith.constant 0 : i32
    %c0_i32_1 = arith.constant 0 : i32
    return %c0_i32, %c0_i32_0 : i32, i32
  }
  func.func @transform_7(%arg0: i32) -> (i32, i32) {
    %c0_i32 = arith.constant 0 : i32
    %c0_i32_0 = arith.constant 0 : i32
    return %arg0, %c0_i32 : i32, i32
  }
}

</mosaic_0001>

<bundles_post_ra>
// kernel: tpu_custom_call.1
= control target key start
LH: loop header
LB: loop body
LE: loop exit
PB: predicated region body
PF: predicated region fallthrough
CT: control target
= control target key end

     0   :  { %v312_v0 = vmov 0   ;;  %v313_v5 = vmov 0.0|0.0   ;;  %v314_v6 = vmov 1   ;;  %vm315_vm0 = vmmov 0   ;;  %s411_s0 = inlined_call_operand.vmem [shape: f32[8,2], index: 0, kind: input, shape index: {}]   ;;  %s412_s3 = inlined_call_operand.vmem [shape: f32[32,64], index: 3, kind: input, shape index: {}]   ;;  %s413_s5 = inlined_call_operand.vmem [shape: f32[64,2], index: 5, kind: input, shape index: {}]   ;;  %s414_s1 = inlined_call_operand.vmem [shape: f32[2,32], index: 1, kind: input, shape index: {}]   ;;  %s415_s2 = inlined_call_operand.vmem [shape: f32[1,32], index: 2, kind: input, shape index: {}]   ;;  %s416_s4 = inlined_call_operand.vmem [shape: f32[1,64], index: 4, kind: input, shape index: {}]   ;;  %s417_s6 = inlined_call_operand.vmem [shape: f32[1,2], index: 6, kind: input, shape index: {}]   ;;  %s418_s7 = inlined_call_operand.vmem [shape: f32[8,2], index: 7, kind: output, shape index: {}]  }
   0x1   :  { %310 = vset.pattern.permute.xlu0 %v312_v0  ;;  %v26_v1 = vld [vmem:[%s411_s0] sm:$0xff]  ;;  %v58_v3 = vld [vmem:[%s412_s3 + $0x8] sm:$0xff]  ;;  %287 = vmatprep.subr.bf16.mxu0 %v313_v5  ;;  %v59_v7 = vld [vmem:[%s412_s3 + $0x10] sm:$0xff]  ;;  %v316_v10 = vmov 0.0   ;;  %v34_v20 = vlaneseq  ;;  %vm68_vm1 = vcmask 261120   ;;  %vm158_vm2 = vcmask 523264  }
   0x2   :  { %31 = vperm.xlu0 %310, %v26_v1   ;;  %v57_v2 = vld [vmem:[%s412_s3] sm:$0xff]  ;;  %293 = vmatprep.subr.bf16.mxu1 %v313_v5  ;;  %v60_v8 = vld [vmem:[%s412_s3 + $0x18] sm:$0xff]  ;;  %v144_v12 = vld [vmem:[%s413_s5 + $0x8] sm:$0xff]  ;;  %vm232_vm3 = vcmask 15360  }
   0x3   :  { %v288_v4 = vpack.c.bf16 %v58_v3, %v57_v2  ;;  %v291_v9 = vpack.c.bf16 %v60_v8, %v59_v7  ;;  %265 = vmatprep.mubr.msk.f32.mxu0 %vm315_vm0, %v316_v10  ;;  %284 = vmatprep.mubr.msk.f32.mxu1 %vm315_vm0, %v316_v10  ;;  %v143_v11 = vld [vmem:[%s413_s5] sm:$0xff]  ;;  %v145_v13 = vld [vmem:[%s413_s5 + $0x10] sm:$0xff]  ;;  %v146_v15 = vld [vmem:[%s413_s5 + $0x18] sm:$0xff]  ;;  %v35_v21 = vshrl.u32 %v34_v20, 7 }
   0x4   :  { %v294_v14 = vpack.c.bf16 %v144_v12, %v143_v11  ;;  %v297_v16 = vpack.c.bf16 %v146_v15, %v145_v13  ;;  %v147_v17 = vld [vmem:[%s413_s5 + $0x20] sm:$0xff]  ;;  %v148_v18 = vld [vmem:[%s413_s5 + $0x28] sm:$0xff]  ;;  %v149_v35 = vld [vmem:[%s413_s5 + $0x30] sm:$0xff] }
   0x5   :  { %289 = vmatpush3.bf16.msra.mxu0 %v288_v4  ;;  %v300_v19 = vpack.c.bf16 %v148_v18, %v147_v17  ;;  %v36_v22 = vsub.s32 0, %v35_v21  ;;  %v27_v23 = vld [vmem:[%s414_s1] sm:$0x3]  ;;  %v52_v25 = vsub.s32 1, %v35_v21  ;;  %v150_v36 = vld [vmem:[%s413_s5 + $0x38] sm:$0xff] }
   0x6   :  { %311 = vset.pattern.permute.xlu0 %v314_v6  ;;  %290 = vmatprep.subr.bf16.mxu0 %v313_v5  ;;  %v238_v29 = vld [vmem:[%s415_s2] ss:$0 sm:$0xff]  ;;  %v303_v37 = vpack.c.bf16 %v150_v36, %v149_v35 }
   0x7   :  { %47 = vperm.xlu0 %311, %v26_v1   ;;  %295 = vmatpush3.bf16.msra.mxu1 %v294_v14  ;;  %v37_v24 = vrot.slane %v27_v23, %v36_v22  ;;  %v53_v28 = vrot.slane %v27_v23, %v52_v25  ;;  %v239_v38 = vld [vmem:[%s416_s4] ss:$0 sm:$0xff] }
   0x8   :  { %296 = vmatprep.subr.bf16.mxu1 %v313_v5  ;;  %v241_v43 = vld [vmem:[%s417_s6] ss:$0 sm:$0xff] }
   0x9   :  { %292 = vmatpush3.bf16.msra.mxu0 %v291_v9 }
   0xb   :  { %298 = vmatpush3.bf16.msra.mxu1 %v297_v16 }
   0xc   :  { %299 = vmatprep.subr.bf16.mxu1 %v313_v5 }
   0xf   :  { %301 = vmatpush3.bf16.msra.mxu1 %v300_v19 }
  0x10   :  { %302 = vmatprep.subr.bf16.mxu1 %v313_v5 }
  0x13   :  { %304 = vmatpush3.bf16.msra.mxu1 %v303_v37 }
  0x81   :  { %v32_v26 = vpop.permute.xlu0 %31 }
  0x82   :  { %v38_v27 = vmul.f32 %v37_v24, %v32_v26 }
  0x84   :  { %v45_v31 = vadd.f32 %v238_v29, %v38_v27 }
  0x86   :  { %v48_v30 = vpop.permute.xlu0 %47 }
  0x87   :  { %v54_v32 = vmul.f32 %v53_v28, %v48_v30 }
  0x89   :  { %v55_v33 = vadd.f32 %v54_v32, %v45_v31 }
  0x8b   :  { %v56_v34 = vmax.f32 %v55_v33, 0.0 }
  0x8d   :  { %266 = vmatmul.mubr.msk.f32.vlgmr.msra.gmra.mrb[0].mxu0 %vm68_vm1, %v56_v34 }
 0x160   :  { %v138_v39 = vpop.f32.mrb[0].mxu0 }
 0x161   :  { %v139_v40 = vadd.f32 %v239_v38, %v138_v39  ;;  %v267_v41 = vpop.f32.mrb[1].mxu0 }
 0x163   :  { %v142_v42 = vmax.f32 %v139_v40, 0.0 }
 0x165   :  { %285 = vmatmul.mubr.msk.f32.vlgmr.msra.gmra.mrb[0].mxu1 %vm158_vm2, %v142_v42 }
 0x238   :  { %v228_v44 = vpop.f32.mrb[0].mxu1 }
 0x239   :  { %v229_v45 = vadd.f32 %v241_v43, %v228_v44  ;;  %v286_v46 = vpop.f32.mrb[1].mxu1 }
 0x23b   :  { %233 = vst.msk [vmem:[%s418_s7] sm:$0xff] %vm232_vm3, %v229_v45 }

</bundles_post_ra>
